<compile_context>
chip_gen: v5e
topology: v5e:2x2
jax: 0.10.0
libtpu: 0.0.40
codegen_flags: <defaults>
</compile_context>

<pallas_src>
import functools
import math

import jax
import jax.numpy as jnp
from jax.experimental import pallas as pl
from jax.experimental.pallas import tpu as pltpu

# 32 MiB is the scoped-VMEM default on v6e/v7x and far below every chip's
# physical VMEM (v5e/v6e 128 MiB, v7x 64 MiB) -> one limit is safe everywhere.
_VMEM_LIMIT_BYTES = 32 * 1024 * 1024
# ~4 MiB blocks: measured ~86%+ of HBM roofline for a tiled f32 add; with three
# double-buffered streams the peak footprint is ~24 MiB < 32 MiB.
_TARGET_BLOCK_BYTES = 4 * 1024 * 1024
_MAX_BLOCK_BYTES = 4 * 1024 * 1024


def make_sinusoidal_pe(max_len, d_model, dtype=jnp.float32):
    """(max_len, d_model) sinusoidal table matching the PyTorch buffer `pe`.

    Precompute once per model (already cast to the activation dtype) so the hot
    path does no per-call PE preprocessing.
    """
    assert d_model % 2 == 0, "sinusoidal PE requires an even d_model (as in the PyTorch module)"
    position = jnp.arange(max_len, dtype=jnp.float32)[:, None]                 # (L, 1)
    div_term = jnp.exp(jnp.arange(0, d_model, 2, dtype=jnp.float32)
                       * (-math.log(10000.0) / d_model))                       # (D/2,)
    pe = jnp.stack([jnp.sin(position * div_term),
                    jnp.cos(position * div_term)], axis=-1).reshape(max_len, d_model)
    return pe.astype(dtype)


# --------------------------------------------------------------------------- #
# Kernels
# --------------------------------------------------------------------------- #
def _add_pe_bcast_kernel(x_ref, pe_ref, o_ref):
    # x/o: (TS, B, TD); pe: (TS, 1, TD) -> cheap sublane broadcast over batch.
    o_ref[...] = x_ref[...] + pe_ref[...]


def _add_pe_slab_kernel(x_ref, pe_ref, o_ref, *, reps):
    # x/o: (TS, L); pe: (TS, L // reps). The PE tile is replicated across the
    # lane axis in VMEM instead of reading an HBM-materialized tiled copy.
    pe = pe_ref[...]
    if reps > 1:
        pe = jnp.tile(pe, (1, reps))
    o_ref[...] = x_ref[...] + pe


# --------------------------------------------------------------------------- #
# Tiling heuristics
# --------------------------------------------------------------------------- #
def _round_up(v, m):
    return ((v + m - 1) // m) * m


def _choose_seq_tile(S, row_bytes, *, align, target_block_bytes):
    """~target_block_bytes per block, `align`-row aligned, and capped so the
    grid has >= 2 steps (lets v7x's two TensorCores both get work)."""
    rows = max(1, target_block_bytes // max(row_bytes, 1))
    rows = max(align, (rows // align) * align)
    if S >= 2 * align:
        rows = min(rows, max(align, _round_up(pl.cdiv(S, 2), align)))
    if rows >= S:
        return S                      # full extent is always a legal block dim
    return rows


def _choose_lane_tile(D, col_block_bytes, max_block_bytes):
    """Largest multiple-of-128 divisor of D whose 8-row block fits the budget."""
    if D * col_block_bytes <= max_block_bytes or D % 128 != 0:
        return D
    divs = [c for c in range(128, D + 1, 128) if D % c == 0]
    fitting = [c for c in divs if c * col_block_bytes <= max_block_bytes]
    return max(fitting) if fitting else min(divs)


def _choose_fold(S, lane):
    """Smallest k dividing S with (k*lane) % 128 == 0 (preferring k*lane >= 512),
    so folding k sequence rows into lanes gives an unmasked lane-dense slab."""
    if lane % 128 == 0:
        return 1
    cands = [k for k in range(1, S + 1) if S % k == 0 and (k * lane) % 128 == 0]
    if not cands:
        return None
    big = [k for k in cands if k * lane >= 512]
    return min(big) if big else min(cands)


# --------------------------------------------------------------------------- #
# pallas_call wrappers
# --------------------------------------------------------------------------- #
def _dense_call(x, pe, *, seq_tile, target_block_bytes, max_block_bytes, donate_x):
    S, B, D = x.shape
    itemsize = x.dtype.itemsize
    TD = _choose_lane_tile(D, 8 * B * itemsize, max_block_bytes)
    TS = seq_tile if seq_tile is not None else _choose_seq_tile(
        S, B * TD * itemsize, align=8, target_block_bytes=target_block_bytes)
    TS = min(TS, S)
    grid = (pl.cdiv(S, TS), pl.cdiv(D, TD))
    cost = pl.CostEstimate(flops=S * B * D, transcendentals=0,
                           bytes_accessed=(2 * S * B * D + S * D) * itemsize)
    return pl.pallas_call(
        _add_pe_bcast_kernel,
        out_shape=jax.ShapeDtypeStruct((S, B, D), x.dtype),
        grid=grid,
        in_specs=[
            pl.BlockSpec((TS, B, TD), lambda i, j: (i, 0, j)),
            pl.BlockSpec((TS, 1, TD), lambda i, j: (i, 0, j)),
        ],
        out_specs=pl.BlockSpec((TS, B, TD), lambda i, j: (i, 0, j)),
        compiler_params=pltpu.CompilerParams(
            dimension_semantics=("parallel", "parallel"),
            vmem_limit_bytes=_VMEM_LIMIT_BYTES,
        ),
        cost_estimate=cost,
        input_output_aliases=({0: 0} if donate_x else {}),
    )(x, pe[:, None, :])


def _slab_call(x2, pe_src, reps, *, seq_tile, target_block_bytes, donate_x, sublane_pack):
    S2, L = x2.shape
    itemsize = x2.dtype.itemsize
    TS = seq_tile if seq_tile is not None else _choose_seq_tile(
        S2, L * itemsize, align=sublane_pack, target_block_bytes=target_block_bytes)
    TS = min(TS, S2)
    grid = (pl.cdiv(S2, TS),)
    Dp = pe_src.shape[1]
    cost = pl.CostEstimate(flops=S2 * L, transcendentals=0,
                           bytes_accessed=(2 * S2 * L + S2 * Dp) * itemsize)
    return pl.pallas_call(
        functools.partial(_add_pe_slab_kernel, reps=reps),
        out_shape=jax.ShapeDtypeStruct((S2, L), x2.dtype),
        grid=grid,
        in_specs=[
            pl.BlockSpec((TS, L), lambda i: (i, 0)),
            pl.BlockSpec((TS, Dp), lambda i: (i, 0)),
        ],
        out_specs=pl.BlockSpec((TS, L), lambda i: (i, 0)),
        compiler_params=pltpu.CompilerParams(
            dimension_semantics=("parallel",),
            vmem_limit_bytes=_VMEM_LIMIT_BYTES,
        ),
        cost_estimate=cost,
        input_output_aliases=({0: 0} if donate_x else {}),
    )(x2, pe_src)


def positional_encoding_forward(x, pe_table, *,
                                target_block_bytes=_TARGET_BLOCK_BYTES,
                                max_block_bytes=_MAX_BLOCK_BYTES,
                                seq_tile=None,
                                donate_x=False):
    """Eval-mode PositionalEncoding.forward: out = x + pe_table[:seq_len].

    x: (seq_len, batch, d_model); pe_table: (max_len, d_model).
    """
    S, B, D = x.shape
    itemsize = x.dtype.itemsize
    # Sub-32-bit dtypes pack along sublanes, so a "dense" batch axis needs
    # B % (8 * 32-bit words/elem): 8 for f32, 16 for bf16, 32 for int8/fp8.
    sublane_pack = max(8, (8 * 4) // itemsize)

    # PE slice + dtype match. Cheap, constant-folded when pe_table is a jit
    # constant; hot-path callers should pass a pre-cast table so both ops vanish.
    pe = pe_table[:S]
    if pe.dtype != x.dtype:
        pe = pe.astype(x.dtype)

    row_bytes = B * D * itemsize
    dense_ok = D % 128 == 0
    wide_rows = 8 * row_bytes > max_block_bytes

    if dense_ok and (B % sublane_pack == 0 or wide_rows):
        # Keep (S, B, D): lane/sublane dense (or rows too wide for the slab's
        # single stream). pe broadcasts over batch inside the kernel; a second
        # grid axis tiles d_model when 8-row blocks would blow the VMEM budget.
        return _dense_call(x, pe, seq_tile=seq_tile,
                           target_block_bytes=target_block_bytes,
                           max_block_bytes=max_block_bytes, donate_x=donate_x)

    lane = B * D
    if lane % 128 == 0 and dense_ok:
        # Lane-dense slab (S, B*D): unmasked stores. PE travels as a (TS, D)
        # block and is replicated across lanes inside the kernel (no
        # HBM-materialized tiled PE -> ~2N instead of ~4N HBM traffic).
        out2 = _slab_call(x.reshape(S, lane), pe, B, seq_tile=seq_tile,
                          target_block_bytes=target_block_bytes,
                          donate_x=donate_x, sublane_pack=sublane_pack)
        return out2.reshape(S, B, D)

    k = _choose_fold(S, lane)
    if k is not None:
        # Small / oddly-shaped B*D (e.g. the module's (8, 2, 32)): fold k seq
        # rows into lanes so the store slab is k*B*D wide (multiple of 128,
        # >=512 where possible) -> unmasked vector stores. The PE source is
        # expanded the same way in the wrapper; it is at most x-sized on this
        # (small-shape) path, so wrapper-side expansion is the cheap option.
        S2, L2 = S // k, k * lane
        x2 = x.reshape(S2, L2)
        pe2 = jnp.broadcast_to(pe[:, None, :], (S, B, D)).reshape(S2, L2)
        out2 = _slab_call(x2, pe2, 1, seq_tile=seq_tile,
                          target_block_bytes=target_block_bytes,
                          donate_x=donate_x, sublane_pack=sublane_pack)
        return out2.reshape(S, B, D)

    # Fallback (no legal lane-dense fold, e.g. prime S with odd B*D):
    # correct, but with masked partial stores on the lane tail.
    x2 = x.reshape(S, lane)
    pe2 = jnp.broadcast_to(pe[:, None, :], (S, B, D)).reshape(S, lane)
    out2 = _slab_call(x2, pe2, 1, seq_tile=seq_tile,
                      target_block_bytes=target_block_bytes,
                      donate_x=donate_x, sublane_pack=sublane_pack)
    return out2.reshape(S, B, D)


if __name__ == "__main__":
    max_len = 64
    key = jax.random.PRNGKey(0)

    def check(seq_len, batch, d_model, *, seq_tile=None, donate_x=False,
              use_jit=False, dtype=jnp.float32):
        k = jax.random.fold_in(key, seq_len * 100003 + batch * 1009 + d_model)
        x = jax.random.normal(k, (seq_len, batch, d_model), dtype=jnp.float32).astype(dtype)
        pe_table = make_sinusoidal_pe(max_len, d_model, dtype=dtype)
        # Eval-mode reference (computed before the call so donation stays valid).
        ref = x + pe_table[:seq_len][:, None, :]
        fwd = functools.partial(positional_encoding_forward,
                                seq_tile=seq_tile, donate_x=donate_x)
        if use_jit:
            fwd = jax.jit(fwd, donate_argnums=(0,) if donate_x else ())
        y = jax.block_until_ready(fwd(x, pe_table))
        assert y.shape == (seq_len, batch, d_model) and y.dtype == dtype
        tol = 1e-6 if dtype == jnp.float32 else 2e-2
        assert jnp.allclose(y, ref, atol=tol), (
            f"mismatch vs reference for {(seq_len, batch, d_model, dtype)}")

    # Primary small shape implied by the module (fold path -> one (1, 512) lane-dense block).
    check(8, 2, 32)
    # Dense (S, B, D) path with a multi-step seq grid.
    check(24, 8, 128, seq_tile=8)
    # Lane-dense slab path: PE replicated across lanes inside the kernel, multi-step grid.
    check(24, 2, 128, seq_tile=8)
    # bf16: dtype-aware dense predicate (needs B % 16) routes B=8 to the slab path.
    check(16, 8, 128, dtype=jnp.bfloat16)
    # Jitted + donated input: exercises input_output_aliases={0: 0}.
    check(32, 8, 128, donate_x=True, use_jit=True)

    print("KERNEL_OK")
</pallas_src>

<mosaic_0001>
module attributes {stable_mosaic.version = 11 : i64} {
  func.func @_add_pe_slab_kernel(%arg0: i32, %arg1: memref<1x512xf32, #tpu.memory_space<vmem>>, %arg2: memref<1x512xf32, #tpu.memory_space<vmem>>, %arg3: memref<1x512xf32, #tpu.memory_space<vmem>>) attributes {dimension_semantics = [#tpu.dimension_semantics<parallel>], iteration_bounds = array<i64: 1>, scalar_prefetch = 0 : i64, scratch_operands = 0 : i64, tpu.core_type = #tpu.core_type<tc>, window_params = [{transform_indices = @transform_0, window_bounds = array<i64: 1, 512>}, {transform_indices = @transform_1, window_bounds = array<i64: 1, 512>}, {transform_indices = @transform_2, window_bounds = array<i64: 1, 512>}]} {
    %c0 = arith.constant 0 : index
    %c0_0 = arith.constant 0 : index
    %0 = vector.load %arg2[%c0, %c0_0] : memref<1x512xf32, #tpu.memory_space<vmem>>, vector<1x512xf32>
    %c0_1 = arith.constant 0 : index
    %c0_2 = arith.constant 0 : index
    %1 = vector.load %arg1[%c0_1, %c0_2] : memref<1x512xf32, #tpu.memory_space<vmem>>, vector<1x512xf32>
    %2 = arith.addf %1, %0 : vector<1x512xf32>
    %c0_3 = arith.constant 0 : index
    %c0_4 = arith.constant 0 : index
    %3 = vector.load %arg3[%c0_3, %c0_4] : memref<1x512xf32, #tpu.memory_space<vmem>>, vector<1x512xf32>
    tpu.vector_store %arg3[%c0_3, %c0_4], %2 {strides = array<i32>} : memref<1x512xf32, #tpu.memory_space<vmem>>, vector<1x512xf32>,
    return
  }
  func.func @transform_0(%arg0: i32) -> (i32, i32) {
    %c0_i32 = arith.constant 0 : i32
    %c0_i32_0 = arith.constant 0 : i32
    return %arg0, %c0_i32 : i32, i32
  }
  func.func @transform_1(%arg0: i32) -> (i32, i32) {
    %c0_i32 = arith.constant 0 : i32
    %c0_i32_0 = arith.constant 0 : i32
    return %arg0, %c0_i32 : i32, i32
  }
  func.func @transform_2(%arg0: i32) -> (i32, i32) {
    %c0_i32 = arith.constant 0 : i32
    %c0_i32_0 = arith.constant 0 : i32
    return %arg0, %c0_i32 : i32, i32
  }
}

</mosaic_0001>

<bundles_post_ra>
// kernel: tpu_custom_call.1
= control target key start
LH: loop header
LB: loop body
LE: loop exit
PB: predicated region body
PF: predicated region fallthrough
CT: control target
= control target key end

     0   :  { %7 = vsyncpa [#allocation3], 0  ;;  %s174_s0 = inlined_call_operand.hbm [shape: f32[1,512], index: 0, kind: input, shape index: {}]   ;;  %s175_s1 = inlined_call_operand.hbm [shape: f32[1,512], index: 1, kind: input, shape index: {}]   ;;  %s176_s2 = inlined_call_operand.hbm [shape: f32[1,512], index: 2, kind: output, shape index: {}]  }
   0x1   :  { %8 = vsyncpa [#allocation6], 0 }
   0x2   :  { %9 = vsyncpa [#allocation4], 0  ;;  %s15_s11 = sshll.u32 %s174_s0, 4  ;;  %s147_s12 = smov [#allocation2]   ;;  %s16_s11 = int_to_ptr.hbm [resolvable:$true] %s15_s11 }
   0x3   :  { %s17_s13 = sshll.u32 %s147_s12, 4  ;;  %s26_s16 = sshll.u32 %s175_s1, 4  ;;  %s18_s13 = int_to_ptr.vmem [resolvable:$true] %s17_s13  ;;  %s27_s16 = int_to_ptr.hbm [resolvable:$true] %s26_s16 }
   0x4   :  { %20 = dma.hbm_to_vmem [thread:$0]  %s16_s11, 64, %s18_s13, [#allocation3]  }
   0x5   :  { %s148_s17 = smov [#allocation5]  }
   0x6   :  { %s28_s18 = sshll.u32 %s148_s17, 4  ;;  %s29_s18 = int_to_ptr.vmem [resolvable:$true] %s28_s18 }
   0x7   :  { %31 = dma.hbm_to_vmem [thread:$0]  %s27_s16, 64, %s29_s18, [#allocation6]  }
   0x8   :  { %141 = dma.done.wait [#allocation3], 64  }
   0x9   :  { %142 = vsyncadd [#allocation3], 4294967232 }
   0xa   :  { %143 = dma.done.wait [#allocation6], 64  }
   0xb   :  { %144 = vsyncadd [#allocation6], 4294967232  ;;  %v43_v0 = vlaneseq  ;;  %s149_s0 = smov [#allocation7]   ;;  %s55_s22 = sshll.u32 %s176_s2, 4  ;;  %v40_v1 = vld [vmem:[#allocation5] sm:$0xf]  ;;  %s56_s22 = int_to_ptr.hbm [resolvable:$true] %s55_s22 }
   0xc   :  { %s53_s19 = sshll.u32 %s149_s0, 4  ;;  %v41_v2 = vld [vmem:[#allocation2] sm:$0xf]  ;;  %s54_s19 = int_to_ptr.vmem [resolvable:$true] %s53_s19 }
   0xd   :  { %vm45_vm0 = vcmp.lt.s32.totalorder %v43_v0, 512  ;;  %v42_v3 = vadd.f32 %v41_v2, %v40_v1 }
   0xf   :  { %47 = vst.msk [vmem:[#allocation7] sm:$0xf] %vm45_vm0, %v42_v3 }
  0x10   :  { %58 = dma.vmem_to_hbm [thread:$0]  %s54_s19, 64, %s56_s22, [#allocation4]  }
  0x11   :  { %145 = dma.done.wait [#allocation4], 64  }
  0x12   :  { %146 = vsyncadd [#allocation4], 4294967232 }
  0x13   :  { %63 = vsyncpa [#allocation3], 1 }
  0x14   :  { %64 = vsyncpa [#allocation6], 1 }
  0x15   :  { %65 = vsyncpa [#allocation4], 1 }

</bundles_post_ra>
